<compile_context>
chip_gen: v7x
topology: tpu7x:2x2x1
jax: 0.10.0
libtpu: 0.0.40
codegen_flags: <defaults>
</compile_context>

<pallas_src>
import functools

import jax
import jax.numpy as jnp
from jax.experimental import pallas as pl
from jax.experimental.pallas import tpu as pltpu

_LANE = 128  # pad the 3-wide output of the second matmul to one full lane vector


def _round_up(x, m):
    return (x + m - 1) // m * m


def _mlp_edge_kernel(hs_ref, hd_ref, w1a_ref, w1b_ref, b1_ref, w2p_ref, b2p_ref, o_ref):
    # hs_ref/hd_ref : (tile_e, F)  bf16   edge-endpoint features (src / dst rows of h)
    # w1a_ref/w1b_ref: (F, F)      bf16   top / bottom halves of W1^T
    # b1_ref        : (1, F)       f32
    # w2p_ref       : (F, 128)     f32    W2^T zero-padded to 128 output columns
    # b2p_ref       : (1, 128)     f32    b2 zero-padded
    # o_ref         : (tile_e, 128) f32
    hid = (
        jnp.dot(hs_ref[...], w1a_ref[...], preferred_element_type=jnp.float32)
        + jnp.dot(hd_ref[...], w1b_ref[...], preferred_element_type=jnp.float32)
        + b1_ref[...]
    )
    hid = jnp.maximum(hid, 0.0)  # ReLU in f32
    out = jnp.dot(hid, w2p_ref[...], preferred_element_type=jnp.float32) + b2p_ref[...]
    o_ref[...] = out


@functools.partial(jax.jit, static_argnames=("tile_e",))
def mlp_predictor_scores(h, src_ids, dst_ids, w1, b1, w2, b2, *, tile_e=2048):
    """Per-edge scores: W2(relu(W1(concat(h[src], h[dst]))))  -> (E, 3) float32."""
    assert tile_e % 8 == 0
    E = src_ids.shape[0]
    _, F = h.shape

    # Pick an effective tile (shrinks for tiny E) and pad E up to a tile multiple.
    tile = min(tile_e, _round_up(max(E, 1), 8))
    E_pad = _round_up(E, tile)
    if E_pad != E:
        pad = E_pad - E
        src_ids = jnp.concatenate([src_ids, jnp.zeros((pad,), src_ids.dtype)])
        dst_ids = jnp.concatenate([dst_ids, jnp.zeros((pad,), dst_ids.dtype)])

    # Gather endpoint features in bf16 (halves HBM traffic of the dominant streams);
    # no concat is materialized -- W1 is split instead.
    h_bf16 = h.astype(jnp.bfloat16)
    h_src = jnp.take(h_bf16, src_ids, axis=0)          # (E_pad, F)
    h_dst = jnp.take(h_bf16, dst_ids, axis=0)          # (E_pad, F)

    w1_t = w1.T                                         # (2F, F)
    w1a = w1_t[:F].astype(jnp.bfloat16)                 # applied to h[src]
    w1b = w1_t[F:].astype(jnp.bfloat16)                 # applied to h[dst]
    b1_2d = b1.reshape(1, F).astype(jnp.float32)

    # Zero-pad the 3-wide output projection to 128 lanes (lane-dense stores);
    # padding columns stay exactly zero and are sliced off below.
    w2p = jnp.zeros((F, _LANE), jnp.float32).at[:, :3].set(w2.T.astype(jnp.float32))
    b2p = jnp.zeros((1, _LANE), jnp.float32).at[:, :3].set(b2.astype(jnp.float32))

    grid = (E_pad // tile,)
    out = pl.pallas_call(
        _mlp_edge_kernel,
        out_shape=jax.ShapeDtypeStruct((E_pad, _LANE), jnp.float32),
        grid_spec=pltpu.PrefetchScalarGridSpec(
            num_scalar_prefetch=0,
            grid=grid,
            in_specs=[
                pl.BlockSpec((tile, F), lambda i: (i, 0)),      # h[src] tile
                pl.BlockSpec((tile, F), lambda i: (i, 0)),      # h[dst] tile
                pl.BlockSpec((F, F), lambda i: (0, 0)),         # W1^T top    (resident)
                pl.BlockSpec((F, F), lambda i: (0, 0)),         # W1^T bottom (resident)
                pl.BlockSpec((1, F), lambda i: (0, 0)),         # b1          (resident)
                pl.BlockSpec((F, _LANE), lambda i: (0, 0)),     # W2^T padded (resident)
                pl.BlockSpec((1, _LANE), lambda i: (0, 0)),     # b2 padded   (resident)
            ],
            out_specs=pl.BlockSpec((tile, _LANE), lambda i: (i, 0)),
        ),
        compiler_params=pltpu.CompilerParams(
            dimension_semantics=("parallel",),                  # megacore-shardable on v7x
        ),
    )(h_src, h_dst, w1a, w1b, b1_2d, w2p, b2p)

    return out[:E, :3]


def _reference(h, src_ids, dst_ids, w1, b1, w2, b2):
    x = jnp.concatenate([h[src_ids], h[dst_ids]], axis=1)
    hid = jnp.maximum(x @ w1.T + b1, 0.0)
    return hid @ w2.T + b2


if __name__ == "__main__":
    h_feats = 32
    num_nodes = 8
    num_edges = 50  # deliberately not a multiple of the tile to exercise padding

    key = jax.random.PRNGKey(0)
    k_h, k_src, k_dst, k_w1, k_b1, k_w2, k_b2 = jax.random.split(key, 7)

    # Node features and edge list (small synthetic graph; stands in for the DGL graph).
    h = jax.random.normal(k_h, (num_nodes, h_feats), dtype=jnp.float32)
    src_ids = jax.random.randint(k_src, (num_edges,), 0, num_nodes, dtype=jnp.int32)
    dst_ids = jax.random.randint(k_dst, (num_edges,), 0, num_nodes, dtype=jnp.int32)

    # Deterministic parameter init (PyTorch Linear-style uniform +-1/sqrt(fan_in)).
    fan1 = 2 * h_feats
    lim1 = 1.0 / jnp.sqrt(jnp.float32(fan1))
    w1 = jax.random.uniform(k_w1, (h_feats, fan1), jnp.float32, -lim1, lim1)
    b1 = jax.random.uniform(k_b1, (h_feats,), jnp.float32, -lim1, lim1)

    fan2 = h_feats
    lim2 = 1.0 / jnp.sqrt(jnp.float32(fan2))
    w2 = jax.random.uniform(k_w2, (3, fan2), jnp.float32, -lim2, lim2)
    b2 = jax.random.uniform(k_b2, (3,), jnp.float32, -lim2, lim2)

    scores = mlp_predictor_scores(h, src_ids, dst_ids, w1, b1, w2, b2, tile_e=2048)
    scores = jax.block_until_ready(scores)

    ref = _reference(h, src_ids, dst_ids, w1, b1, w2, b2)
    assert scores.shape == (num_edges, 3)
    # bf16 input streams => loosened tolerance vs the full-f32 reference.
    assert jnp.allclose(scores, ref, atol=2e-2, rtol=2e-2), (
        float(jnp.max(jnp.abs(scores - ref)))
    )

    print("KERNEL_OK")
</pallas_src>

<mosaic_0001>
module attributes {stable_mosaic.version = 11 : i64} {
  func.func @_mlp_edge_kernel(%arg0: i32, %arg1: memref<56x32xbf16, #tpu.memory_space<vmem>>, %arg2: memref<56x32xbf16, #tpu.memory_space<vmem>>, %arg3: memref<32x32xbf16, #tpu.memory_space<vmem>>, %arg4: memref<32x32xbf16, #tpu.memory_space<vmem>>, %arg5: memref<1x32xf32, #tpu.memory_space<vmem>>, %arg6: memref<32x128xf32, #tpu.memory_space<vmem>>, %arg7: memref<1x128xf32, #tpu.memory_space<vmem>>, %arg8: memref<56x128xf32, #tpu.memory_space<vmem>>) attributes {dimension_semantics = [#tpu.dimension_semantics<parallel>], iteration_bounds = array<i64: 1>, scalar_prefetch = 0 : i64, scratch_operands = 0 : i64, tpu.core_type = #tpu.core_type<tc>, window_params = [{transform_indices = @transform_0, window_bounds = array<i64: 56, 32>}, {transform_indices = @transform_1, window_bounds = array<i64: 56, 32>}, {pipeline_mode = #tpu.pipeline_mode<synchronous>, transform_indices = @transform_2, window_bounds = array<i64: 32, 32>}, {pipeline_mode = #tpu.pipeline_mode<synchronous>, transform_indices = @transform_3, window_bounds = array<i64: 32, 32>}, {pipeline_mode = #tpu.pipeline_mode<synchronous>, transform_indices = @transform_4, window_bounds = array<i64: 1, 32>}, {pipeline_mode = #tpu.pipeline_mode<synchronous>, transform_indices = @transform_5, window_bounds = array<i64: 32, 128>}, {pipeline_mode = #tpu.pipeline_mode<synchronous>, transform_indices = @transform_6, window_bounds = array<i64: 1, 128>}, {transform_indices = @transform_7, window_bounds = array<i64: 56, 128>}]} {
    %c0 = arith.constant 0 : index
    %c0_0 = arith.constant 0 : index
    %0 = vector.load %arg1[%c0, %c0_0] : memref<56x32xbf16, #tpu.memory_space<vmem>>, vector<56x32xbf16>
    %c0_1 = arith.constant 0 : index
    %c0_2 = arith.constant 0 : index
    %1 = vector.load %arg3[%c0_1, %c0_2] : memref<32x32xbf16, #tpu.memory_space<vmem>>, vector<32x32xbf16>
    %cst = arith.constant dense<0.000000e+00> : vector<56x32xf32>
    %2 = tpu.matmul %0, %1, %cst {dimension_numbers = #tpu.dot_dimension_numbers<[1], [0], [0], [1], [0, 0, 1, 1], [], []>} : vector<56x32xbf16>, vector<32x32xbf16>, vector<56x32xf32> -> vector<56x32xf32>
    %c0_3 = arith.constant 0 : index
    %c0_4 = arith.constant 0 : index
    %3 = vector.load %arg2[%c0_3, %c0_4] : memref<56x32xbf16, #tpu.memory_space<vmem>>, vector<56x32xbf16>
    %c0_5 = arith.constant 0 : index
    %c0_6 = arith.constant 0 : index
    %4 = vector.load %arg4[%c0_5, %c0_6] : memref<32x32xbf16, #tpu.memory_space<vmem>>, vector<32x32xbf16>
    %cst_7 = arith.constant dense<0.000000e+00> : vector<56x32xf32>
    %5 = tpu.matmul %3, %4, %cst_7 {dimension_numbers = #tpu.dot_dimension_numbers<[1], [0], [0], [1], [0, 0, 1, 1], [], []>} : vector<56x32xbf16>, vector<32x32xbf16>, vector<56x32xf32> -> vector<56x32xf32>
    %6 = arith.addf %2, %5 : vector<56x32xf32>
    %c0_8 = arith.constant 0 : index
    %c0_9 = arith.constant 0 : index
    %7 = vector.load %arg5[%c0_8, %c0_9] : memref<1x32xf32, #tpu.memory_space<vmem>>, vector<1x32xf32>
    %8 = vector.broadcast %7 : vector<1x32xf32> to vector<56x32xf32>
    %9 = arith.addf %6, %8 : vector<56x32xf32>
    %cst_10 = arith.constant 0.000000e+00 : f32
    %10 = vector.broadcast %cst_10 : f32 to vector<56x32xf32>
    %11 = arith.maximumf %9, %10 : vector<56x32xf32>
    %c0_11 = arith.constant 0 : index
    %c0_12 = arith.constant 0 : index
    %12 = vector.load %arg6[%c0_11, %c0_12] : memref<32x128xf32, #tpu.memory_space<vmem>>, vector<32x128xf32>
    %cst_13 = arith.constant dense<0.000000e+00> : vector<56x128xf32>
    %13 = tpu.matmul %11, %12, %cst_13 {dimension_numbers = #tpu.dot_dimension_numbers<[1], [0], [0], [1], [0, 0, 1, 1], [], []>} : vector<56x32xf32>, vector<32x128xf32>, vector<56x128xf32> -> vector<56x128xf32>
    %c0_14 = arith.constant 0 : index
    %c0_15 = arith.constant 0 : index
    %14 = vector.load %arg7[%c0_14, %c0_15] : memref<1x128xf32, #tpu.memory_space<vmem>>, vector<1x128xf32>
    %15 = vector.broadcast %14 : vector<1x128xf32> to vector<56x128xf32>
    %16 = arith.addf %13, %15 : vector<56x128xf32>
    %c0_16 = arith.constant 0 : index
    %c0_17 = arith.constant 0 : index
    %17 = vector.load %arg8[%c0_16, %c0_17] : memref<56x128xf32, #tpu.memory_space<vmem>>, vector<56x128xf32>
    tpu.vector_store %arg8[%c0_16, %c0_17], %16 {strides = array<i32>} : memref<56x128xf32, #tpu.memory_space<vmem>>, vector<56x128xf32>,
    return
  }
  func.func @transform_0(%arg0: i32) -> (i32, i32) {
    %c0_i32 = arith.constant 0 : i32
    %c0_i32_0 = arith.constant 0 : i32
    return %arg0, %c0_i32 : i32, i32
  }
  func.func @transform_1(%arg0: i32) -> (i32, i32) {
    %c0_i32 = arith.constant 0 : i32
    %c0_i32_0 = arith.constant 0 : i32
    return %arg0, %c0_i32 : i32, i32
  }
  func.func @transform_2(%arg0: i32) -> (i32, i32) {
    %c0_i32 = arith.constant 0 : i32
    %c0_i32_0 = arith.constant 0 : i32
    %c0_i32_1 = arith.constant 0 : i32
    return %c0_i32, %c0_i32_0 : i32, i32
  }
  func.func @transform_3(%arg0: i32) -> (i32, i32) {
    %c0_i32 = arith.constant 0 : i32
    %c0_i32_0 = arith.constant 0 : i32
    %c0_i32_1 = arith.constant 0 : i32
    return %c0_i32, %c0_i32_0 : i32, i32
  }
  func.func @transform_4(%arg0: i32) -> (i32, i32) {
    %c0_i32 = arith.constant 0 : i32
    %c0_i32_0 = arith.constant 0 : i32
    %c0_i32_1 = arith.constant 0 : i32
    return %c0_i32, %c0_i32_0 : i32, i32
  }
  func.func @transform_5(%arg0: i32) -> (i32, i32) {
    %c0_i32 = arith.constant 0 : i32
    %c0_i32_0 = arith.constant 0 : i32
    %c0_i32_1 = arith.constant 0 : i32
    return %c0_i32, %c0_i32_0 : i32, i32
  }
  func.func @transform_6(%arg0: i32) -> (i32, i32) {
    %c0_i32 = arith.constant 0 : i32
    %c0_i32_0 = arith.constant 0 : i32
    %c0_i32_1 = arith.constant 0 : i32
    return %c0_i32, %c0_i32_0 : i32, i32
  }
  func.func @transform_7(%arg0: i32) -> (i32, i32) {
    %c0_i32 = arith.constant 0 : i32
    %c0_i32_0 = arith.constant 0 : i32
    return %arg0, %c0_i32 : i32, i32
  }
}

</mosaic_0001>

<bundles_post_ra>
// kernel: mlp_predictor_scores.1
= control target key start
LH: loop header
LB: loop body
LE: loop exit
PB: predicated region body
PF: predicated region fallthrough
CT: control target
= control target key end

     0   :  { %vm79_vm0 = vcmask 261120   ;;  %v556_v12 = vmov 0.0|0.0   ;;  %vm557_vm1 = vmmov 0   ;;  %v558_v19 = vmov 0.0   ;;  %s696_s3 = inlined_call_operand.vmem [shape: bf16[32,32], index: 3, kind: input, shape index: {}]   ;;  %s697_s1 = inlined_call_operand.vmem [shape: bf16[56,32], index: 1, kind: input, shape index: {}]   ;;  %s698_s2 = inlined_call_operand.vmem [shape: bf16[32,32], index: 2, kind: input, shape index: {}]   ;;  %s699_s0 = inlined_call_operand.vmem [shape: bf16[56,32], index: 0, kind: input, shape index: {}]   ;;  %s700_s5 = inlined_call_operand.vmem [shape: f32[32,128], index: 5, kind: input, shape index: {}]   ;;  %s701_s4 = inlined_call_operand.vmem [shape: f32[1,32], index: 4, kind: input, shape index: {}]   ;;  %s702_s6 = inlined_call_operand.vmem [shape: f32[1,128], index: 6, kind: input, shape index: {}]   ;;  %s703_s7 = inlined_call_operand.vmem [shape: f32[56,128], index: 7, kind: output, shape index: {}]  }
   0x1   :  { %v544_v0 = vld [vmem:[%s696_s3] sm:$0xff]   ;;  %v545_v1 = vld [vmem:[%s696_s3 + $0x8] sm:$0xff]   ;;  %v549_v5 = vld [vmem:[%s697_s1 + $0x10] sm:$0xff]   ;;  %531 = vmatprep.subr.bf16.mxu1 %v556_v12  ;;  %510 = vmatprep.mubr.msk.f32.mxu1 %vm557_vm1, %v558_v19 }
   0x2   :  { %478 = vmatprep.subr.bf16.mxu0 %v544_v0  ;;  %v546_v2 = vld [vmem:[%s697_s1] sm:$0xff]   ;;  %v547_v4 = vld [vmem:[%s697_s1 + $0x8] sm:$0xff]   ;;  %v550_v7 = vld [vmem:[%s697_s1 + $0x18] ss:$0 sps:$4 sm:$0xff]  }
   0x3   :  { %479 = vmatpush3.bf16.msra.mxu0 %v544_v0  ;;  %482 = vmatprep.mubr.msk.bf16.mxu0 %vm79_vm0, %v546_v2  ;;  %v548_v3 = vld [vmem:[%s698_s2] sm:$0xff]   ;;  %v551_v6 = vld [vmem:[%s698_s2 + $0x8] sm:$0xff]   ;;  %v554_v10 = vld [vmem:[%s699_s0 + $0x10] sm:$0xff]  }
   0x4   :  { %480 = vmatprep.subr.bf16.mxu0 %v545_v1  ;;  %v552_v8 = vld [vmem:[%s699_s0] sm:$0xff]   ;;  %v553_v9 = vld [vmem:[%s699_s0 + $0x8] sm:$0xff]   ;;  %v555_v11 = vld [vmem:[%s699_s0 + $0x18] ss:$0 sps:$4 sm:$0xff]  }
   0x5   :  { %v283_v13 = vld [vmem:[%s700_s5] sm:$0xff]  ;;  %v284_v14 = vld [vmem:[%s700_s5 + $0x8] sm:$0xff]  ;;  %v285_v16 = vld [vmem:[%s700_s5 + $0x10] sm:$0xff] }
   0x6   :  { %v532_v15 = vpack.c.bf16 %v284_v14, %v283_v13  ;;  %v286_v17 = vld [vmem:[%s700_s5 + $0x18] sm:$0xff]  ;;  %v446_v24 = vld [vmem:[%s701_s4] ss:$0 sm:$0xff] }
   0x7   :  { %481 = vmatpush3.bf16.msra.mxu0 %v545_v1  ;;  %v535_v18 = vpack.c.bf16 %v286_v17, %v285_v16  ;;  %v447_v50 = vld [vmem:[%s702_s6] ss:$0 sm:$0xff] }
   0x8   :  { %490 = vmatprep.subr.bf16.mxu0 %v548_v3  ;;  %533 = vmatpush3.bf16.msra.mxu1 %v532_v15 }
   0x9   :  { %534 = vmatprep.subr.bf16.mxu1 %v556_v12 }
   0xa   :  { %483 = vmatmul.mubr.msk.bf16.vlgmr.msra.gmra.mrb[0].mxu0 %vm79_vm0, %v547_v4 }
   0xb   :  { %491 = vmatpush3.bf16.msra.mxu0 %v548_v3  ;;  %486 = vmatprep.mubr.msk.bf16.mxu0 %vm79_vm0, %v549_v5 }
   0xc   :  { %492 = vmatprep.subr.bf16.mxu0 %v551_v6  ;;  %536 = vmatpush3.bf16.msra.mxu1 %v535_v18 }
   0xf   :  { %493 = vmatpush3.bf16.msra.mxu0 %v551_v6 }
  0x12   :  { %487 = vmatmul.mubr.msk.bf16.gmra.mrb[4].mxu0 %vm79_vm0, %v550_v7 }
  0x13   :  { %494 = vmatprep.mubr.msk.bf16.mxu0 %vm79_vm0, %v552_v8 }
  0x1a   :  { %495 = vmatmul.mubr.msk.bf16.vlgmr.msra.gmra.mrb[0].mxu0 %vm79_vm0, %v553_v9 }
  0x1b   :  { %498 = vmatprep.mubr.msk.bf16.mxu0 %vm79_vm0, %v554_v10 }
  0x22   :  { %499 = vmatmul.mubr.msk.bf16.gmra.mrb[8].mxu0 %vm79_vm0, %v555_v11 }
  0xe5   :  { %v488_v20 = vpop.f32.mrb[4].mxu0 }
  0xe6   :  { %v142_v21 = vpop.f32.mrb[5].mxu0 }
  0xe7   :  { %v489_v22 = vpop.f32.mrb[6].mxu0 }
  0xe8   :  { %v145_v23 = vpop.f32.mrb[7].mxu0 }
  0xed   :  { %v496_v25 = vpop.f32.mrb[0].mxu0 }
  0xee   :  { %v232_v26 = vpop.f32.mrb[1].mxu0  ;;  %v271_v32 = vadd.f32 %v496_v25, %v446_v24 }
  0xef   :  { %v269_v27 = vadd.f32 %v446_v24, %v232_v26  ;;  %v497_v28 = vpop.f32.mrb[2].mxu0 }
  0xf0   :  { %v235_v29 = vpop.f32.mrb[3].mxu0  ;;  %v278_v40 = vmax.f32 %v271_v32, 0.0  ;;  %v272_v41 = vadd.f32 %v497_v28, %v446_v24 }
  0xf1   :  { %v276_v30 = vmax.f32 %v269_v27, 0.0  ;;  %v270_v31 = vadd.f32 %v446_v24, %v235_v29 }
  0xf2   :  { %v279_v43 = vmax.f32 %v272_v41, 0.0 }
  0xf3   :  { %511 = vmatmul.mubr.msk.f32.vlgmr.msra.gmra.mrb[0].mxu1 %vm79_vm0, %v276_v30  ;;  %v277_v33 = vmax.f32 %v270_v31, 0.0 }
  0xf4   :  { %513 = vmatprep.mubr.msk.f32.mxu1 %vm557_vm1, %v558_v19 }
  0xf5   :  { %v500_v34 = vpop.f32.mrb[8].mxu0 }
  0xf6   :  { %v257_v35 = vadd.f32 %v500_v34, %v488_v20  ;;  %v248_v36 = vpop.f32.mrb[9].mxu0 }
  0xf7   :  { %v249_v37 = vadd.f32 %v248_v36, %v142_v21  ;;  %v501_v38 = vpop.f32.mrb[10].mxu0  ;;  %514 = vmatmul.mubr.msk.f32.gmra.mrb[2].mxu1 %vm79_vm0, %v277_v33 }
  0xf8   :  { %v251_v39 = vpop.f32.mrb[11].mxu0  ;;  %516 = vmatprep.mubr.msk.f32.mxu1 %vm557_vm1, %v558_v19  ;;  %v275_v47 = vadd.f32 %v446_v24, %v257_v35 }
  0xf9   :  { %v252_v42 = vadd.f32 %v251_v39, %v145_v23  ;;  %v273_v44 = vadd.f32 %v446_v24, %v249_v37 }
  0xfa   :  { %v282_v49 = vmax.f32 %v275_v47, 0.0 }
  0xfb   :  { %517 = vmatmul.mubr.msk.f32.gmra.mrb[4].mxu1 %vm79_vm0, %v278_v40  ;;  %v280_v45 = vmax.f32 %v273_v44, 0.0  ;;  %v274_v46 = vadd.f32 %v446_v24, %v252_v42 }
  0xfc   :  { %519 = vmatprep.mubr.msk.f32.mxu1 %vm557_vm1, %v558_v19 }
  0xfd   :  { %v281_v48 = vmax.f32 %v274_v46, 0.0 }
  0xff   :  { %520 = vmatmul.mubr.msk.f32.gmra.mrb[6].mxu1 %vm79_vm0, %v279_v43 }
 0x100   :  { %522 = vmatprep.mubr.msk.f32.mxu1 %vm557_vm1, %v558_v19 }
 0x103   :  { %523 = vmatmul.mubr.msk.f32.gmra.mrb[8].mxu1 %vm79_vm0, %v280_v45 }
 0x104   :  { %525 = vmatprep.mubr.msk.f32.mxu1 %vm557_vm1, %v558_v19 }
 0x107   :  { %526 = vmatmul.mubr.msk.f32.gmra.mrb[10].mxu1 %vm79_vm0, %v281_v48 }
 0x108   :  { %528 = vmatprep.mubr.msk.f32.mxu1 %vm557_vm1, %v558_v19 }
 0x10b   :  { %529 = vmatmul.mubr.msk.f32.gmra.mrb[12].mxu1 %vm79_vm0, %v282_v49 }
 0x1c6   :  { %v381_v51 = vpop.f32.mrb[0].mxu1 }
 0x1c7   :  { %v382_v52 = vadd.f32 %v447_v50, %v381_v51  ;;  %v512_v53 = vpop.f32.mrb[1].mxu1 }
 0x1c9   :  { %415 = vst [vmem:[%s703_s7] sm:$0xff] %v382_v52 }
 0x1ca   :  { %v386_v54 = vpop.f32.mrb[2].mxu1 }
 0x1cb   :  { %v387_v55 = vadd.f32 %v447_v50, %v386_v54  ;;  %v515_v56 = vpop.f32.mrb[3].mxu1 }
 0x1cd   :  { %416 = vst [vmem:[%s703_s7 + $0x8] sm:$0xff] %v387_v55 }
 0x1ce   :  { %v391_v57 = vpop.f32.mrb[4].mxu1 }
 0x1cf   :  { %v392_v58 = vadd.f32 %v447_v50, %v391_v57  ;;  %v518_v59 = vpop.f32.mrb[5].mxu1 }
 0x1d1   :  { %417 = vst [vmem:[%s703_s7 + $0x10] sm:$0xff] %v392_v58 }
 0x1d2   :  { %v396_v60 = vpop.f32.mrb[6].mxu1 }
 0x1d3   :  { %v397_v61 = vadd.f32 %v447_v50, %v396_v60  ;;  %v521_v62 = vpop.f32.mrb[7].mxu1 }
 0x1d5   :  { %418 = vst [vmem:[%s703_s7 + $0x18] sm:$0xff] %v397_v61 }
 0x1d6   :  { %v401_v63 = vpop.f32.mrb[8].mxu1 }
 0x1d7   :  { %v402_v0 = vadd.f32 %v447_v50, %v401_v63  ;;  %v524_v1 = vpop.f32.mrb[9].mxu1 }
 0x1d9   :  { %419 = vst [vmem:[%s703_s7 + $0x20] sm:$0xff] %v402_v0 }
 0x1da   :  { %v406_v2 = vpop.f32.mrb[10].mxu1 }
 0x1db   :  { %v407_v3 = vadd.f32 %v447_v50, %v406_v2  ;;  %v527_v4 = vpop.f32.mrb[11].mxu1 }
 0x1dd   :  { %420 = vst [vmem:[%s703_s7 + $0x28] sm:$0xff] %v407_v3 }
 0x1de   :  { %v411_v5 = vpop.f32.mrb[12].mxu1 }
 0x1df   :  { %v412_v6 = vadd.f32 %v447_v50, %v411_v5  ;;  %v530_v7 = vpop.f32.mrb[13].mxu1 }
 0x1e1   :  { %421 = vst [vmem:[%s703_s7 + $0x30] sm:$0xff] %v412_v6 }

</bundles_post_ra>
